<compile_context>
chip_gen: v7x
topology: tpu7x:2x2x1
jax: 0.10.0
libtpu: 0.0.40
codegen_flags: <defaults>
</compile_context>

<pallas_src>
import jax
import jax.numpy as jnp
from jax.experimental import pallas as pl
from jax.experimental.pallas import tpu as pltpu


# -----------------------------------------------------------------------------
# Kernel
# -----------------------------------------------------------------------------
def wine_mlp_kernel(x_ref, w1_ref, b1_ref, w2_ref, b2_ref, o_ref):
    """One batch tile of   out = relu(x @ W1^T + b1) @ W2^T + b2.

    Layouts (batch on the lane axis throughout):
      x_ref  : (in_dim, tb)    feature-major activation tile
      w1_ref : (hidden, in_dim)
      b1_ref : (hidden, 1)
      w2_ref : (hidden, 1)
      b2_ref : (1,) scalar in SMEM
      o_ref  : (1, tb)         lane-dense output row
    """
    # Any dtype cast of x happens here, inside the kernel (free filler under
    # the matmul) -- never as a separate wrapper-side XLA pass over x.
    x = x_ref[...].astype(w1_ref.dtype)

    # fc1 on the MXU: (hidden, in) @ (in, tb) -> (hidden, tb), f32 accumulator.
    # K sits on w1's lane axis and x's sublane axis: native MXU feed, no
    # in-kernel transpose of the activation tile.
    h_t = jnp.dot(w1_ref[...], x, preferred_element_type=jnp.float32)

    # Bias + ReLU epilogue in f32 on the VPU (b1 is (hidden, 1)).
    h_t = jnp.maximum(h_t + b1_ref[...], 0.0)

    # fc2 (out_features == 1) on the VPU + XLU (sublane reduce) instead of a
    # wasteful N=1 MXU matmul:  out[0, b] = sum_j h_t[j, b] * w2[j] + b2.
    out_row = jnp.sum(h_t * w2_ref[...], axis=0, keepdims=True)        # (1, tb)
    o_ref[...] = (out_row + b2_ref[0]).astype(o_ref.dtype)             # lane-dense store


# -----------------------------------------------------------------------------
# Host-side helpers
# -----------------------------------------------------------------------------
def _round_up(v, m):
    return -(-v // m) * m


def _pick_batch_tile(B, block_b, min_grid_steps):
    """Choose (tile, grid, padded_B) for the batch axis."""
    want_split = (B > block_b) or (min_grid_steps > 1)
    if not want_split or B < 128 * max(min_grid_steps, 2):
        return B, 1, B                       # single resident tile, no padding
    steps = max(min_grid_steps, pl.cdiv(B, block_b))
    per_step = pl.cdiv(B, steps)
    tb = max(128, _round_up(per_step, 128))  # lane-aligned -> unmasked vst
    grid = pl.cdiv(B, tb)
    return tb, grid, tb * grid


def _vmem_estimate_bytes(tb, in_dim, hidden, itemsize):
    """Rough per-step VMEM footprint: double-buffered x/out blocks, the
    (hidden, tb) f32 intermediate, plus resident weights."""
    tb_p = _round_up(tb, 128)
    x_blk = _round_up(in_dim, 8) * tb_p * itemsize
    out_blk = 8 * tb_p * 4
    h_blk = _round_up(hidden, 8) * tb_p * 4
    weights = (_round_up(hidden, 8) * _round_up(in_dim, 128) * itemsize
               + 2 * _round_up(hidden, 8) * 128 * 4)
    return 2 * x_blk + 2 * out_blk + 2 * h_blk + weights


def prepare_wine_params(w1, b1, w2, b2, *, compute_dtype=jnp.float32):
    """One-time parameter prep (no per-call reshapes/casts).

    Default compute_dtype=f32 keeps exact torch fc1 semantics; pass
    jnp.bfloat16 to quantize the fc1 operands -- the matching cast of x then
    happens inside the kernel, never as a separate wrapper-side pass.

    w1: [hidden, in] (torch layout, kept as-is), b1: [hidden],
    w2: [out=1, hidden], b2: [out=1].
    """
    hidden, _ = w1.shape
    assert w2.shape[0] == 1, "WineModel has a single 'quality' output"
    return {
        "w1": w1.astype(compute_dtype),                    # MXU operand
        "b1": b1.reshape(hidden, 1).astype(jnp.float32),   # f32 epilogue
        "w2": w2.reshape(hidden, 1).astype(jnp.float32),   # column for VPU fc2
        "b2": b2.reshape(1).astype(jnp.float32),           # scalar -> SMEM
    }


def wine_model_forward(x, params, *, block_b=8192, min_grid_steps=1,
                       x_is_feature_major=False):
    """x: [B, in_dim] (torch layout) -> [B, 1], matching WineModel.forward.

    block_b:        batch rows per grid step (big tiles amortize the ~0.35us
                    per-step overhead; single step whenever B <= block_b).
    min_grid_steps: set to 2 on v7x so the "parallel" batch axis engages both
                    TensorCores; leave at 1 on v5e / v6e (single TC).
    x_is_feature_major: pass True if x is already (in_dim, B); avoids the
                    wrapper-side transpose (pure layout plumbing).
    """
    w1, b1, w2, b2 = params["w1"], params["b1"], params["w2"], params["b2"]
    hidden, in_dim = w1.shape

    if x_is_feature_major:
        x_fm, B = x, x.shape[1]
    else:
        B = x.shape[0]
        # Layout plumbing only: feature-major puts batch on lanes so the
        # 11-wide feature dim pads to sublanes (not to 128 lanes) and the MXU
        # feed is transpose-free.  Keep activations feature-major upstream to
        # avoid even this transpose.
        x_fm = x.T                                           # (in_dim, B)

    tb, grid, b_pad = _pick_batch_tile(B, block_b, min_grid_steps)
    if b_pad != B:
        x_fm = jnp.pad(x_fm, ((0, 0), (0, b_pad - B)))       # ragged batch

    vmem_est = _vmem_estimate_bytes(tb, in_dim, hidden, x_fm.dtype.itemsize)
    cp_kwargs = dict(dimension_semantics=("parallel",))
    if vmem_est > (12 << 20):
        # Large tiles: raise the scoped-VMEM limit (capped at v7x's 64 MiB
        # physical) so the tuned tile still compiles on v5e's 16 MiB default.
        cp_kwargs["vmem_limit_bytes"] = int(min(64 << 20, vmem_est + (4 << 20)))

    out_row = pl.pallas_call(
        wine_mlp_kernel,
        out_shape=jax.ShapeDtypeStruct((1, b_pad), jnp.float32),
        grid=(grid,),
        in_specs=[
            pl.BlockSpec((in_dim, tb), lambda i: (0, i)),        # x tile (pipelined)
            pl.BlockSpec((hidden, in_dim), lambda i: (0, 0)),    # weights VMEM-resident
            pl.BlockSpec((hidden, 1), lambda i: (0, 0)),
            pl.BlockSpec((hidden, 1), lambda i: (0, 0)),
            pl.BlockSpec(memory_space=pltpu.MemorySpace.SMEM),   # scalar b2 in SMEM
        ],
        out_specs=pl.BlockSpec((1, tb), lambda i: (0, i)),       # lane-dense output
        compiler_params=pltpu.CompilerParams(**cp_kwargs),
        cost_estimate=pl.CostEstimate(
            flops=2 * B * hidden * (in_dim + 1),
            transcendentals=0,
            bytes_accessed=(x_fm.size * x_fm.dtype.itemsize
                            + w1.size * w1.dtype.itemsize
                            + (b1.size + w2.size + b2.size) * 4
                            + b_pad * 4),
        ),
    )(x_fm, w1, b1, w2, b2)

    # (1, b_pad) -> (B, 1): slice off padding (no-op if unpadded), metadata reshape.
    return out_row[0, :B].reshape(B, 1)


def init_linear(key, out_features, in_features):
    """Deterministic init mirroring torch.nn.Linear default U[-1/sqrt(fan_in), +1/sqrt(fan_in)]."""
    kw, kb = jax.random.split(key)
    bound = 1.0 / jnp.sqrt(jnp.float32(in_features))
    w = jax.random.uniform(kw, (out_features, in_features), jnp.float32,
                           minval=-bound, maxval=bound)
    b = jax.random.uniform(kb, (out_features,), jnp.float32,
                           minval=-bound, maxval=bound)
    return w, b


if __name__ == "__main__":
    # winequality-red: 11 input features, 1 output ('quality')
    input_size = 11
    output_size = 1
    number_of_neurons = 32   # hidden width
    batch = 8

    key = jax.random.PRNGKey(0)
    k_x, k_fc1, k_fc2, k_x2 = jax.random.split(key, 4)

    x = jax.random.normal(k_x, (batch, input_size), jnp.float32)
    w1, b1 = init_linear(k_fc1, number_of_neurons, input_size)
    w2, b2 = init_linear(k_fc2, output_size, number_of_neurons)
    params = prepare_wine_params(w1, b1, w2, b2)

    # Small batch: single resident tile, grid=(1,).
    out = jax.block_until_ready(wine_model_forward(x, params))
    assert out.shape == (batch, output_size)
    ref = jnp.maximum(x @ w1.T + b1, 0.0) @ w2.T + b2
    assert jnp.allclose(out, ref, atol=5e-2, rtol=5e-2), \
        float(jnp.max(jnp.abs(out - ref)))

    # Exercise the gridded / ragged-batch path (cdiv + zero padding + slice).
    batch2 = 300
    x2 = jax.random.normal(k_x2, (batch2, input_size), jnp.float32)
    out2 = jax.block_until_ready(wine_model_forward(x2, params, block_b=128))
    assert out2.shape == (batch2, output_size)
    ref2 = jnp.maximum(x2 @ w1.T + b1, 0.0) @ w2.T + b2
    assert jnp.allclose(out2, ref2, atol=5e-2, rtol=5e-2), \
        float(jnp.max(jnp.abs(out2 - ref2)))

    # TODO(synk): training_step / validation_* (L1 loss, epoch bookkeeping) are
    # host-side training utilities, not part of the forward kernel.
    print("KERNEL_OK")
</pallas_src>

<mosaic_0001>
module attributes {stable_mosaic.version = 11 : i64} {
  func.func @wine_mlp_kernel(%arg0: i32, %arg1: memref<11x8xf32, #tpu.memory_space<vmem>>, %arg2: memref<32x11xf32, #tpu.memory_space<vmem>>, %arg3: memref<32x1xf32, #tpu.memory_space<vmem>>, %arg4: memref<32x1xf32, #tpu.memory_space<vmem>>, %arg5: memref<1xf32, #tpu.memory_space<smem>>, %arg6: memref<1x8xf32, #tpu.memory_space<vmem>>) attributes {dimension_semantics = [#tpu.dimension_semantics<parallel>], iteration_bounds = array<i64: 1>, scalar_prefetch = 0 : i64, scratch_operands = 0 : i64, tpu.core_type = #tpu.core_type<tc>, window_params = [{transform_indices = @transform_0, window_bounds = array<i64: 11, 8>}, {pipeline_mode = #tpu.pipeline_mode<synchronous>, transform_indices = @transform_1, window_bounds = array<i64: 32, 11>}, {pipeline_mode = #tpu.pipeline_mode<synchronous>, transform_indices = @transform_2, window_bounds = array<i64: 32, 1>}, {pipeline_mode = #tpu.pipeline_mode<synchronous>, transform_indices = @transform_3, window_bounds = array<i64: 32, 1>}, {transform_indices = @transform_4, window_bounds = array<i64: 1>}, {transform_indices = @transform_5, window_bounds = array<i64: 1, 8>}]} {
    %c0 = arith.constant 0 : index
    %c0_0 = arith.constant 0 : index
    %0 = vector.load %arg1[%c0, %c0_0] : memref<11x8xf32, #tpu.memory_space<vmem>>, vector<11x8xf32>
    %c0_1 = arith.constant 0 : index
    %c0_2 = arith.constant 0 : index
    %1 = vector.load %arg2[%c0_1, %c0_2] : memref<32x11xf32, #tpu.memory_space<vmem>>, vector<32x11xf32>
    %cst = arith.constant dense<0.000000e+00> : vector<32x8xf32>
    %2 = tpu.matmul %1, %0, %cst {dimension_numbers = #tpu.dot_dimension_numbers<[1], [0], [0], [1], [0, 0, 1, 1], [], []>} : vector<32x11xf32>, vector<11x8xf32>, vector<32x8xf32> -> vector<32x8xf32>
    %c0_3 = arith.constant 0 : index
    %c0_4 = arith.constant 0 : index
    %3 = vector.load %arg3[%c0_3, %c0_4] : memref<32x1xf32, #tpu.memory_space<vmem>>, vector<32x1xf32>
    %4 = vector.broadcast %3 : vector<32x1xf32> to vector<32x8xf32>
    %5 = arith.addf %2, %4 : vector<32x8xf32>
    %cst_5 = arith.constant 0.000000e+00 : f32
    %6 = vector.broadcast %cst_5 : f32 to vector<32x8xf32>
    %7 = arith.maximumf %5, %6 : vector<32x8xf32>
    %c0_6 = arith.constant 0 : index
    %c0_7 = arith.constant 0 : index
    %8 = vector.load %arg4[%c0_6, %c0_7] : memref<32x1xf32, #tpu.memory_space<vmem>>, vector<32x1xf32>
    %9 = vector.broadcast %8 : vector<32x1xf32> to vector<32x8xf32>
    %10 = arith.mulf %7, %9 : vector<32x8xf32>
    %cst_8 = arith.constant dense<0.000000e+00> : vector<8xf32>
    %11 = vector.multi_reduction <add>, %10, %cst_8 [0] : vector<32x8xf32> to vector<8xf32>
    %12 = vector.shape_cast %11 : vector<8xf32> to vector<1x8xf32>
    %c0_9 = arith.constant 0 : index
    %13 = memref.load %arg5[%c0_9] : memref<1xf32, #tpu.memory_space<smem>>
    %14 = vector.broadcast %13 : f32 to vector<1x8xf32>
    %15 = arith.addf %12, %14 : vector<1x8xf32>
    %c0_10 = arith.constant 0 : index
    %c0_11 = arith.constant 0 : index
    %16 = vector.load %arg6[%c0_10, %c0_11] : memref<1x8xf32, #tpu.memory_space<vmem>>, vector<1x8xf32>
    tpu.vector_store %arg6[%c0_10, %c0_11], %15 {strides = array<i32>} : memref<1x8xf32, #tpu.memory_space<vmem>>, vector<1x8xf32>,
    return
  }
  func.func @transform_0(%arg0: i32) -> (i32, i32) {
    %c0_i32 = arith.constant 0 : i32
    %c0_i32_0 = arith.constant 0 : i32
    return %c0_i32, %arg0 : i32, i32
  }
  func.func @transform_1(%arg0: i32) -> (i32, i32) {
    %c0_i32 = arith.constant 0 : i32
    %c0_i32_0 = arith.constant 0 : i32
    %c0_i32_1 = arith.constant 0 : i32
    return %c0_i32, %c0_i32_0 : i32, i32
  }
  func.func @transform_2(%arg0: i32) -> (i32, i32) {
    %c0_i32 = arith.constant 0 : i32
    %c0_i32_0 = arith.constant 0 : i32
    %c0_i32_1 = arith.constant 0 : i32
    return %c0_i32, %c0_i32_0 : i32, i32
  }
  func.func @transform_3(%arg0: i32) -> (i32, i32) {
    %c0_i32 = arith.constant 0 : i32
    %c0_i32_0 = arith.constant 0 : i32
    %c0_i32_1 = arith.constant 0 : i32
    return %c0_i32, %c0_i32_0 : i32, i32
  }
  func.func @transform_4(%arg0: i32) -> i32 {
    %c0_i32 = arith.constant 0 : i32
    %c0_i32_0 = arith.constant 0 : i32
    return %c0_i32 : i32
  }
  func.func @transform_5(%arg0: i32) -> (i32, i32) {
    %c0_i32 = arith.constant 0 : i32
    %c0_i32_0 = arith.constant 0 : i32
    return %c0_i32, %arg0 : i32, i32
  }
}

</mosaic_0001>

<bundles_post_ra>
// kernel: tpu_custom_call.1
= control target key start
LH: loop header
LB: loop body
LE: loop exit
PB: predicated region body
PF: predicated region fallthrough
CT: control target
= control target key end

     0   :  { %vm65_vm0 = vcmask 1042432   ;;  %vm277_vm1 = vmmov 1   ;;  %vm52_vm3 = vcmask 89088   ;;  %v278_v9 = vmov 0   ;;  %s371_s0 = inlined_call_operand.vmem [shape: f32[11,8], index: 0, kind: input, shape index: {}]   ;;  %s372_s1 = inlined_call_operand.vmem [shape: f32[32,11], index: 1, kind: input, shape index: {}]   ;;  %s373_s2 = inlined_call_operand.vmem [shape: f32[32,1], index: 2, kind: input, shape index: {}]   ;;  %s374_s3 = inlined_call_operand.vmem [shape: f32[32,1], index: 3, kind: input, shape index: {}]   ;;  %s375_s4 = inlined_call_operand.<no memory space> [shape: f32[1], index: 4, kind: input, shape index: {}]   ;;  %s376_s5 = inlined_call_operand.hbm [shape: f32[1,8], index: 5, kind: output, shape index: {}]  }
   0x1   :  { %v22_v0 = vld [vmem:[%s371_s0] sm:$0xff]  ;;  %v23_v1 = vld [vmem:[%s371_s0 + $0x8] sm:$0x7]  ;;  %vm241_vm2 = vmpackc.low %vm65_vm0, %vm277_vm1  ;;  %251 = vset.pattern.permute.xlu0 %v278_v9  ;;  %252 = vset.pattern.permute.xlu1 %v278_v9 }
   0x2   :  { %v24_v2 = vld [vmem:[%s372_s1] sm:$0xff]  ;;  %v240_v3 = vpack.c.bf16 %v23_v1, %v22_v0  ;;  %v26_v4 = vld [vmem:[%s372_s1 + $0x10] sm:$0xff]  ;;  %v25_v7 = vld [vmem:[%s372_s1 + $0x8] sm:$0xff] }
   0x3   :  { %234 = vmatprep.mubr.msk.f32.mxu0 %vm52_vm3, %v24_v2  ;;  %237 = vmatprep.mubr.msk.f32.mxu1 %vm52_vm3, %v26_v4  ;;  %v28_v5 = vld [vmem:[%s373_s2] sm:$0xff]  ;;  %v30_v6 = vld [vmem:[%s373_s2 + $0x10] sm:$0xff]  ;;  %v27_v8 = vld [vmem:[%s372_s1 + $0x18] sm:$0xff] }
   0x4   :  { %242 = vmatprep.subr.msk.bf16.mxu0 %vm241_vm2, %v240_v3  ;;  %246 = vmatprep.subr.msk.bf16.mxu1 %vm241_vm2, %v240_v3 }
   0x5   :  { %245 = vmatpush3.bf16.msk.msra.mxu0 %vm241_vm2, %v240_v3  ;;  %247 = vmatpush3.bf16.msk.msra.mxu1 %vm241_vm2, %v240_v3 }
   0x6   :  { %11 = vsyncpa [#allocation4], 0  ;;  %34 = vperm.xlu0 %251, %v28_v5   ;;  %44 = vperm.xlu1 %252, %v30_v6   ;;  %v29_v10 = vld [vmem:[%s373_s2 + $0x8] sm:$0xff]  ;;  %v31_v11 = vld [vmem:[%s373_s2 + $0x18] sm:$0xff]  ;;  %vm186_vm4 = vcmask 64512   ;;  %v201_v52 = vstv %s375_s4  ;;  %s279_s19 = smov [#allocation3]  }
   0x7   :  { %v158_v12 = vld [vmem:[%s374_s3] sm:$0xff]  ;;  %v159_v13 = vld [vmem:[%s374_s3 + $0x8] sm:$0xff]  ;;  %v160_v14 = vld [vmem:[%s374_s3 + $0x10] sm:$0xff]  ;;  %s211_s20 = sshll.u32 %s279_s19, 4  ;;  %vm203_vm5 = vcmask 57344   ;;  %s212_s20 = int_to_ptr.vmem [resolvable:$true] %s211_s20 }
   0x8   :  { %235 = vmatmul.mubr.msk.f32.vlgmr.msra.gmra.mrb[0].mxu0 %vm52_vm3, %v25_v7  ;;  %238 = vmatmul.mubr.msk.f32.vlgmr.msra.gmra.mrb[0].mxu1 %vm52_vm3, %v27_v8  ;;  %v161_v15 = vld [vmem:[%s374_s3 + $0x18] sm:$0xff]  ;;  %s253_s21 = scalar_lea.vmem %s212_s20, 16  ;;  %s257_s22 = scalar_lea.vmem %s212_s20, 32 }
   0x9   :  { %p254_p0 = scmp.ne.s32.totalorder %s212_s20, %s253_s21  ;;  %p258_p1 = scmp.lt.s32.totalorder %s212_s20, %s212_s20 }
   0xa   :  { %39 = vperm.xlu0 %251, %v29_v10   ;;  %49 = vperm.xlu1 %252, %v31_v11   ;;  %p259_p2 = scmp.lt.s32.totalorder %s257_s22, %s253_s21 }
   0xc   :  { %p260_p3 = por %p259_p2, %p258_p1 }
   0xe   :  { %164 = vperm.xlu0 %251, %v158_v12   ;;  %169 = vperm.xlu1 %252, %v159_v13   ;;  %p261_p4 = pnand %p260_p3, %p254_p0 }
  0x12   :  { %174 = vperm.xlu0 %251, %v160_v14   ;;  %179 = vperm.xlu1 %252, %v161_v15  }
  0x85   :  { %v35_v16 = vpop.permute.xlu0 %34  ;;  %v45_v17 = vpop.permute.xlu1 %44 }
  0x89   :  { %v40_v18 = vpop.permute.xlu0 %39  ;;  %v50_v19 = vpop.permute.xlu1 %49 }
  0x8d   :  { %v165_v20 = vpop.permute.xlu0 %164  ;;  %v170_v21 = vpop.permute.xlu1 %169 }
  0x91   :  { %v175_v34 = vpop.permute.xlu0 %174  ;;  %v180_v38 = vpop.permute.xlu1 %179 }
  0xdb   :  { %v236_v22 = vpop.f32.mrb[0].mxu0  ;;  %v239_v23 = vpop.f32.mrb[0].mxu1 }
  0xdc   :  { %v141_v24 = vadd.f32 %v236_v22, %v40_v18  ;;  %v151_v25 = vadd.f32 %v239_v23, %v50_v19  ;;  %v135_v26 = vpop.f32.mrb[1].mxu0  ;;  %v145_v27 = vpop.f32.mrb[1].mxu1 }
  0xdd   :  { %v136_v28 = vadd.f32 %v135_v26, %v35_v16  ;;  %v146_v29 = vadd.f32 %v145_v27, %v45_v17 }
  0xde   :  { %v155_v30 = vmax.f32 %v141_v24, 0.0  ;;  %v157_v31 = vmax.f32 %v151_v25, 0.0 }
  0xdf   :  { %v154_v32 = vmax.f32 %v136_v28, 0.0  ;;  %v156_v33 = vmax.f32 %v146_v29, 0.0 }
  0xe0   :  { %v183_v35 = vmul.f32 %v170_v21, %v155_v30  ;;  %v185_v40 = vmul.f32 %v180_v38, %v157_v31 }
  0xe1   :  { %v182_v36 = vmul.f32 %v165_v20, %v154_v32  ;;  %v184_v37 = vmul.f32 %v175_v34, %v156_v33 }
  0xe2   :  { %v188_v39 = vsel %vm186_vm4, %v183_v35, 0.0  ;;  %v192_v45 = vsel %vm186_vm4, %v185_v40, 0.0 }
  0xe3   :  { %v187_v41 = vsel %vm186_vm4, %v182_v36, 0.0  ;;  %v190_v43 = vsel %vm186_vm4, %v184_v37, 0.0 }
  0xe4   :  { %v189_v42 = vadd.f32 %v188_v39, %v187_v41 }
  0xe6   :  { %v191_v44 = vadd.f32 %v190_v43, %v189_v42 }
  0xe8   :  { %v193_v46 = vadd.f32 %v192_v45, %v191_v44 }
  0xea   :  { %v194_v47 = vrot.slane %v193_v46, 4 }
  0xec   :  { %v195_v48 = vadd.f32 %v194_v47, %v193_v46 }
  0xee   :  { %v196_v49 = vrot.slane %v195_v48, 2 }
  0xf0   :  { %v197_v50 = vadd.f32 %v196_v49, %v195_v48 }
  0xf2   :  { %v198_v51 = vrot.slane %v197_v50, 1 }
  0xf4   :  { %v199_v53 = vadd.f32 %v198_v51, %v197_v50 }
  0xf6   :  { %v202_v54 = vadd.f32 %v201_v52, %v199_v53 }
  0xf8   :  { %204 = vst.msk [vmem:[#allocation3] sm:$0x1] %vm203_vm5, %v202_v54 }
  0xf9   :  { %264 = shalt.err (!%p261_p4)
}
  0xfa   :  { %s265_s25 = scalar_lea.hbm %s376_s5, 16 }
  0xfb   :  { %p266_p5 = scmp.ne.s32.totalorder %s376_s5, %s265_s25  ;;  %p269_p6 = scmp.lt.u32.totalorder %s265_s25, %s376_s5 }
  0xfd   :  { %p271_p7 = pnand %p269_p6, %p266_p5 }
  0xff   :  { %274 = shalt.err (!%p271_p7)
}
 0x100   :  { %214 = dma.vmem_to_hbm [thread:$0]  %s212_s20, 16, %s376_s5, [#allocation4]  }
 0x101   :  { %275 = dma.done.wait [#allocation4], 16  }
 0x102   :  { %276 = vsyncadd [#allocation4], 4294967280 }
 0x103   :  { %218 = vsyncpa [#allocation4], 1 }

</bundles_post_ra>
